<compile_context>
chip_gen: v7x
topology: tpu7x:2x2x1
jax: 0.10.0
libtpu: 0.0.40
codegen_flags: <defaults>
</compile_context>

<pallas_src>
import functools

import jax
import jax.numpy as jnp
from jax.experimental import pallas as pl
from jax.experimental.pallas import tpu as pltpu


# ---------------------------------------------------------------------------
# Pallas kernel: fused im2col-GEMM + partial-conv renormalization
# ---------------------------------------------------------------------------
def _partial_conv_kernel(p_ref, ms_ref, w_ref, b_ref, o_ref):
    # p_ref : (K, TM)      input patches (transposed im2col)
    # ms_ref: (1, TM)      mask-conv result per output position (sum of mask taps)
    # w_ref : (Cout, K)    conv weight (im2col layout)
    # b_ref : (Cout, 1)    conv bias
    # o_ref : (Cout, TM)   lane-dense output block
    # conv without bias == (output - output_bias) in the PyTorch reference.
    acc = jnp.dot(w_ref[...], p_ref[...], preferred_element_type=jnp.float32)  # (Cout, TM)

    msum = ms_ref[...]                                    # (1, TM)
    no_update_holes = msum == 0.0
    mask_sum = jnp.where(no_update_holes, 1.0, msum)      # masked_fill_(.., 1.0)
    # Exact per-row reciprocal (values are small integer counts); approx=True
    # would be cheaper but risks exceeding 1e-4 rtol vs the f32 reference.
    inv = 1.0 / mask_sum                                  # (1, TM)

    out = acc * inv + b_ref[...]                          # (x - b)/msum + b
    out = jnp.where(no_update_holes, 0.0, out)            # masked_fill_(.., 0.0)
    o_ref[...] = out.astype(o_ref.dtype)


# ---------------------------------------------------------------------------
# Glue: transposed im2col + analytic mask-sum + pallas_call wrapper
# ---------------------------------------------------------------------------
def _im2col_t(x, kh, kw, stride, pad):
    """x: (N, C, H, W) -> patches (C*kh*kw, N*Ho*Wo), feature order (c, kh, kw)."""
    n, c, h, w = x.shape
    xp = jnp.pad(x, ((0, 0), (0, 0), (pad, pad), (pad, pad)))
    ho = (h + 2 * pad - kh) // stride + 1
    wo = (w + 2 * pad - kw) // stride + 1
    cols = []
    for i in range(kh):
        for j in range(kw):
            cols.append(xp[:, :, i:i + stride * ho:stride, j:j + stride * wo:stride])
    p = jnp.stack(cols, axis=0)                 # (kh*kw, N, C, Ho, Wo)
    p = p.transpose(2, 0, 1, 3, 4)              # (C, kh*kw, N, Ho, Wo)
    return p.reshape(c * kh * kw, n * ho * wo), ho, wo


def _analytic_mask_sum(n, c, h, w, kh, kw, stride, pad, ho, wo):
    """mask == ones  =>  mask-conv output = (#in-bounds taps) * C per (ho, wo)."""
    h_pos = (jnp.arange(ho) * stride - pad)[:, None] + jnp.arange(kh)[None, :]  # (Ho, kh)
    w_pos = (jnp.arange(wo) * stride - pad)[:, None] + jnp.arange(kw)[None, :]  # (Wo, kw)
    taps_h = jnp.sum((h_pos >= 0) & (h_pos < h), axis=1).astype(jnp.float32)    # (Ho,)
    taps_w = jnp.sum((w_pos >= 0) & (w_pos < w), axis=1).astype(jnp.float32)    # (Wo,)
    counts = taps_h[:, None] * taps_w[None, :] * float(c)                       # (Ho, Wo)
    return jnp.broadcast_to(counts[None], (n, ho, wo)).reshape(1, n * ho * wo)


@functools.partial(jax.jit, static_argnames=("stride", "padding", "tile_m"))
def partial_conv(x, weight, bias, *, stride=1, padding=0, tile_m=256):
    """Forward of PartialConv.

    x:      (N, C, H, W)       float32
    weight: (Cout, C, kH, kW)  float32  (input_conv weight)
    bias:   (Cout,)            float32  (input_conv bias)
    returns (N, Cout, Ho, Wo)
    """
    n, c, h, w = x.shape
    cout, _, kh, kw = weight.shape
    assert tile_m % 128 == 0, "tile_m must be a multiple of 128 (lane width)"

    patches, ho, wo = _im2col_t(x, kh, kw, stride, padding)        # (K, R)
    k = c * kh * kw
    rows = n * ho * wo

    # mask == ones_like(x)  =>  mask-conv result is an analytic per-position count.
    msum = _analytic_mask_sum(n, c, h, w, kh, kw, stride, padding, ho, wo)  # (1, R)

    # Pad rows to a multiple of the row tile (padded rows get msum==0 -> output 0,
    # and are sliced off below).
    rows_pad = ((rows + tile_m - 1) // tile_m) * tile_m
    if rows_pad != rows:
        patches = jnp.pad(patches, ((0, 0), (0, rows_pad - rows)))
        msum = jnp.pad(msum, ((0, 0), (0, rows_pad - rows)))

    w_mat = weight.reshape(cout, k)              # (Cout, K) matches patch feature order
    b_mat = bias.reshape(cout, 1)

    grid = (rows_pad // tile_m,)

    out_flat = pl.pallas_call(
        _partial_conv_kernel,
        out_shape=jax.ShapeDtypeStruct((cout, rows_pad), jnp.float32),
        grid_spec=pltpu.PrefetchScalarGridSpec(
            num_scalar_prefetch=0,
            grid=grid,
            in_specs=[
                pl.BlockSpec((k, tile_m), lambda i: (0, i)),      # patches (lane-dense)
                pl.BlockSpec((1, tile_m), lambda i: (0, i)),      # mask-sum row vector
                pl.BlockSpec((cout, k), lambda i: (0, 0)),        # weight (resident)
                pl.BlockSpec((cout, 1), lambda i: (0, 0)),        # bias   (resident)
            ],
            out_specs=pl.BlockSpec((cout, tile_m), lambda i: (0, i)),
        ),
        compiler_params=pltpu.CompilerParams(
            dimension_semantics=("parallel",),
            vmem_limit_bytes=32 * 1024 * 1024,   # safe on v5e/v6e/v7x, roomy for larger tile_m
        ),
    )(patches, msum, w_mat, b_mat)

    out = out_flat[:, :rows].reshape(cout, n, ho, wo)
    return out.transpose(1, 0, 2, 3)             # back to NCHW


# ---------------------------------------------------------------------------
# Pure-JAX reference (mirrors the PyTorch forward) for a sanity check
# ---------------------------------------------------------------------------
def _reference_partial_conv(x, weight, bias, *, stride, padding):
    dn = jax.lax.conv_dimension_numbers(x.shape, weight.shape, ("NCHW", "OIHW", "NCHW"))
    conv = lambda a, w: jax.lax.conv_general_dilated(
        a, w, (stride, stride), [(padding, padding), (padding, padding)],
        dimension_numbers=dn)
    output = conv(x, weight) + bias.reshape(1, -1, 1, 1)
    output_bias = jnp.broadcast_to(bias.reshape(1, -1, 1, 1), output.shape)
    mask = jnp.ones_like(x)
    output_mask = conv(mask, jnp.ones_like(weight))
    no_update_holes = output_mask == 0
    mask_sum = jnp.where(no_update_holes, 1.0, output_mask)
    output_pre = (output - output_bias) / mask_sum + output_bias
    return jnp.where(no_update_holes, 0.0, output_pre)


if __name__ == "__main__":
    # Module config: PartialConv(in_channels=4, out_channels=8, kernel_size=3,
    #                            stride=1, padding=1, bias=True)
    N, C, H, W = 2, 4, 16, 16
    COUT, KH, KW = 8, 3, 3
    STRIDE, PADDING = 1, 1

    key = jax.random.PRNGKey(0)
    kx, kw_, kb_ = jax.random.split(key, 3)
    x = jax.random.normal(kx, (N, C, H, W), dtype=jnp.float32)
    # input_conv weight: kaiming-normal-like deterministic init; bias 0
    # (weights_init('kaiming') sets bias to 0.0).  mask_conv weight is implicitly
    # all-ones via the analytic mask-sum.
    fan_in = C * KH * KW
    weight = jax.random.normal(kw_, (COUT, C, KH, KW), dtype=jnp.float32) * (2.0 / fan_in) ** 0.5
    bias = jnp.zeros((COUT,), dtype=jnp.float32)

    out = partial_conv(x, weight, bias, stride=STRIDE, padding=PADDING)
    out = jax.block_until_ready(out)

    ref = _reference_partial_conv(x, weight, bias, stride=STRIDE, padding=PADDING)
    assert out.shape == (N, COUT, H, W), out.shape
    assert jnp.allclose(out, ref, atol=1e-4, rtol=1e-4), float(jnp.max(jnp.abs(out - ref)))

    # Also exercise a non-zero bias to make sure the (x - b)/msum + b path is right.
    bias2 = jax.random.normal(kb_, (COUT,), dtype=jnp.float32)
    out2 = jax.block_until_ready(partial_conv(x, weight, bias2, stride=STRIDE, padding=PADDING))
    ref2 = _reference_partial_conv(x, weight, bias2, stride=STRIDE, padding=PADDING)
    assert jnp.allclose(out2, ref2, atol=1e-4, rtol=1e-4), float(jnp.max(jnp.abs(out2 - ref2)))

    print("KERNEL_OK")
</pallas_src>

<mosaic_0001>
module attributes {stable_mosaic.version = 11 : i64} {
  func.func @_partial_conv_kernel(%arg0: i32, %arg1: memref<36x256xf32, #tpu.memory_space<vmem>>, %arg2: memref<1x256xf32, #tpu.memory_space<vmem>>, %arg3: memref<8x36xf32, #tpu.memory_space<vmem>>, %arg4: memref<8x1xf32, #tpu.memory_space<vmem>>, %arg5: memref<8x256xf32, #tpu.memory_space<vmem>>) attributes {dimension_semantics = [#tpu.dimension_semantics<parallel>], iteration_bounds = array<i64: 2>, scalar_prefetch = 0 : i64, scratch_operands = 0 : i64, tpu.core_type = #tpu.core_type<tc>, window_params = [{transform_indices = @transform_0, window_bounds = array<i64: 36, 256>}, {transform_indices = @transform_1, window_bounds = array<i64: 1, 256>}, {pipeline_mode = #tpu.pipeline_mode<synchronous>, transform_indices = @transform_2, window_bounds = array<i64: 8, 36>}, {pipeline_mode = #tpu.pipeline_mode<synchronous>, transform_indices = @transform_3, window_bounds = array<i64: 8, 1>}, {transform_indices = @transform_4, window_bounds = array<i64: 8, 256>}]} {
    %c0 = arith.constant 0 : index
    %c0_0 = arith.constant 0 : index
    %0 = vector.load %arg3[%c0, %c0_0] : memref<8x36xf32, #tpu.memory_space<vmem>>, vector<8x36xf32>
    %c0_1 = arith.constant 0 : index
    %c0_2 = arith.constant 0 : index
    %1 = vector.load %arg1[%c0_1, %c0_2] : memref<36x256xf32, #tpu.memory_space<vmem>>, vector<36x256xf32>
    %cst = arith.constant dense<0.000000e+00> : vector<8x256xf32>
    %2 = tpu.matmul %0, %1, %cst {dimension_numbers = #tpu.dot_dimension_numbers<[1], [0], [0], [1], [0, 0, 1, 1], [], []>} : vector<8x36xf32>, vector<36x256xf32>, vector<8x256xf32> -> vector<8x256xf32>
    %c0_3 = arith.constant 0 : index
    %c0_4 = arith.constant 0 : index
    %3 = vector.load %arg2[%c0_3, %c0_4] : memref<1x256xf32, #tpu.memory_space<vmem>>, vector<1x256xf32>
    %cst_5 = arith.constant 0.000000e+00 : f32
    %4 = vector.broadcast %cst_5 : f32 to vector<1x256xf32>
    %5 = arith.cmpf oeq, %3, %4 : vector<1x256xf32>
    %cst_6 = arith.constant 1.000000e+00 : f32
    %6 = vector.broadcast %cst_6 : f32 to vector<1x256xf32>
    %7 = arith.select %5, %6, %3 : vector<1x256xi1>, vector<1x256xf32>
    %cst_7 = arith.constant 1.000000e+00 : f32
    %8 = vector.broadcast %cst_7 : f32 to vector<1x256xf32>
    %9 = arith.divf %8, %7 : vector<1x256xf32>
    %10 = vector.broadcast %9 : vector<1x256xf32> to vector<8x256xf32>
    %11 = arith.mulf %2, %10 : vector<8x256xf32>
    %c0_8 = arith.constant 0 : index
    %c0_9 = arith.constant 0 : index
    %12 = vector.load %arg4[%c0_8, %c0_9] : memref<8x1xf32, #tpu.memory_space<vmem>>, vector<8x1xf32>
    %13 = vector.broadcast %12 : vector<8x1xf32> to vector<8x256xf32>
    %14 = arith.addf %11, %13 : vector<8x256xf32>
    %cst_10 = arith.constant 0.000000e+00 : f32
    %15 = vector.shape_cast %5 : vector<1x256xi1> to vector<1x256xi1>
    %16 = vector.broadcast %15 : vector<1x256xi1> to vector<8x256xi1>
    %17 = vector.broadcast %cst_10 : f32 to vector<8x256xf32>
    %18 = arith.select %16, %17, %14 : vector<8x256xi1>, vector<8x256xf32>
    %c0_11 = arith.constant 0 : index
    %c0_12 = arith.constant 0 : index
    %19 = vector.load %arg5[%c0_11, %c0_12] : memref<8x256xf32, #tpu.memory_space<vmem>>, vector<8x256xf32>
    tpu.vector_store %arg5[%c0_11, %c0_12], %18 {strides = array<i32>} : memref<8x256xf32, #tpu.memory_space<vmem>>, vector<8x256xf32>,
    return
  }
  func.func @transform_0(%arg0: i32) -> (i32, i32) {
    %c0_i32 = arith.constant 0 : i32
    %c0_i32_0 = arith.constant 0 : i32
    return %c0_i32, %arg0 : i32, i32
  }
  func.func @transform_1(%arg0: i32) -> (i32, i32) {
    %c0_i32 = arith.constant 0 : i32
    %c0_i32_0 = arith.constant 0 : i32
    return %c0_i32, %arg0 : i32, i32
  }
  func.func @transform_2(%arg0: i32) -> (i32, i32) {
    %c0_i32 = arith.constant 0 : i32
    %c0_i32_0 = arith.constant 0 : i32
    %c0_i32_1 = arith.constant 0 : i32
    return %c0_i32, %c0_i32_0 : i32, i32
  }
  func.func @transform_3(%arg0: i32) -> (i32, i32) {
    %c0_i32 = arith.constant 0 : i32
    %c0_i32_0 = arith.constant 0 : i32
    %c0_i32_1 = arith.constant 0 : i32
    return %c0_i32, %c0_i32_0 : i32, i32
  }
  func.func @transform_4(%arg0: i32) -> (i32, i32) {
    %c0_i32 = arith.constant 0 : i32
    %c0_i32_0 = arith.constant 0 : i32
    return %c0_i32, %arg0 : i32, i32
  }
}

</mosaic_0001>

<bundles_post_ra>
// kernel: partial_conv.1
= control target key start
LH: loop header
LB: loop body
LE: loop exit
PB: predicated region body
PF: predicated region fallthrough
CT: control target
= control target key end

     0   :  { %s568_s15 = smov 0   ;;  %s570_s16 = smov 0   ;;  %s629_s0 = inlined_call_operand.vmem [shape: f32[36,512], index: 0, kind: input, shape index: {}]   ;;  %s630_s1 = inlined_call_operand.vmem [shape: f32[1,512], index: 1, kind: input, shape index: {}]   ;;  %s631_s2 = inlined_call_operand.vmem [shape: f32[8,36], index: 2, kind: input, shape index: {}]   ;;  %s632_s3 = inlined_call_operand.vmem [shape: f32[8,1], index: 3, kind: input, shape index: {}]   ;;  %s633_s4 = inlined_call_operand.vmem [shape: f32[8,512], index: 4, kind: output, shape index: {}]  }
   0x1   :  { %s572_s17 = smov 0  }
   0x2 LB: > { %s462_s18 = sadd.s32 4294967295, %s539_s17   ;;  %s585_s19 = sadd.s32 1, %s539_s17   ;;  %s539_s17 = sphi %s572_s17, %s636_s17   ;;  %s535_s16 = sphi %s570_s16, %s635_s16   ;;  %s531_s15 = sphi %s568_s15, %s634_s15  }
   0x3   : > { %s18_s20 = ssub.s32 %s539_s17, %s585_s19  ;;  %s21_s21 = sadd.s32 1, %s535_s16 }
   0x4   : > { %p19_p0 = scmp.eq.s32.totalorder %s18_s20, 0  ;;  %p28_p1 = scmp.ne.s32.totalorder %s535_s16, %s531_s15 }
   0x5   : > { %p29_p2 = scmp.eq.s32.totalorder %s539_s17, 0  ;;  %p465_p4 = scmp.ge.s32.totalorder %s539_s17, 2 }
   0x6   : > { %s594_s22 = scalar_select %p19_p0, %s535_s16, %s21_s21  }
   0x7   : > { %p30_p3 = por %p29_p2, %p28_p1  ;;  %154 = sbr.rel (%p465_p4) target bundleno = 23 (0x17), region = 24 }
   0xe   : > { %157 = sbr.rel (!%p30_p3) target bundleno = 23 (0x17), region = 28  ;;  %s159_s23 = sand.u32 (%p30_p3), 1, %s535_s16  }
   0xf   : > { %s477_s24 = sshll.u32 (%p30_p3), %s539_s17, 4  ;;  %s486_s25 = smul.u32 (%p30_p3), 80, %s159_s23 }
  0x10   : > { %s164_s28 = scalar_lea.vmem (%p30_p3), %s629_s0, %s477_s24 }
  0x11   : > { %v177_v0 = vld [vmem:[%s164_s28] sm:$0xff] (%p30_p3)  ;;  %v179_v1 = vld [vmem:[%s164_s28 + $0x8] sm:$0xff] (%p30_p3)  ;;  %s161_s29 = scalar_lea.vmem (%p30_p3), [#allocation2], %s486_s25 }
  0x12   : > { %v181_v2 = vld [vmem:[%s164_s28 + $0x20] sm:$0xff] (%p30_p3)  ;;  %v183_v3 = vld [vmem:[%s164_s28 + $0x28] sm:$0xff] (%p30_p3)  ;;  %178 = vst [vmem:[%s161_s29] sm:$0xff] (%p30_p3), %v177_v0  ;;  %180 = vst [vmem:[%s161_s29 + $0x8] sm:$0xff] (%p30_p3), %v179_v1 }
  0x13   : > { %v185_v4 = vld [vmem:[%s164_s28 + $0x40] sm:$0xff] (%p30_p3)  ;;  %v187_v5 = vld [vmem:[%s164_s28 + $0x48] sm:$0xff] (%p30_p3)  ;;  %182 = vst [vmem:[%s161_s29 + $0x10] sm:$0xff] (%p30_p3), %v181_v2  ;;  %184 = vst [vmem:[%s161_s29 + $0x18] sm:$0xff] (%p30_p3), %v183_v3 }
  0x14   : > { %186 = vst [vmem:[%s161_s29 + $0x20] sm:$0xff] (%p30_p3), %v185_v4  ;;  %188 = vst [vmem:[%s161_s29 + $0x28] sm:$0xff] (%p30_p3), %v187_v5  ;;  %v189_v6 = vld [vmem:[%s164_s28 + $0x60] sm:$0xff] (%p30_p3)  ;;  %v191_v7 = vld [vmem:[%s164_s28 + $0x68] sm:$0xff] (%p30_p3) }
  0x15   : > { %v193_v8 = vld [vmem:[%s164_s28 + $0x80] sm:$0xff]  ;;  %190 = vst [vmem:[%s161_s29 + $0x30] sm:$0xff] %v189_v6  ;;  %192 = vst [vmem:[%s161_s29 + $0x38] sm:$0xff] %v191_v7  ;;  %v195_v9 = vld [vmem:[%s164_s28 + $0x88] sm:$0xff] }
  0x16   : > { %194 = vst [vmem:[%s161_s29 + $0x40] sm:$0xff] %v193_v8  ;;  %196 = vst [vmem:[%s161_s29 + $0x48] sm:$0xff] %v195_v9 }
  0x17 PF: > { %p468_p5 = scmp.ge.s32.totalorder %s539_s17, 1  ;;  %p209_p6 = scmp.lt.s32.totalorder %s539_s17, 3 }
  0x19   : > { %p210_p7 = pnand %p468_p5, %p209_p6 }
  0x1a   : > { %s216_s30 = sand.u32 (!%p210_p7), 1, %s531_s15   ;;  %v541_v10 = vmov (!%p210_p7), 0.0   ;;  %v542_v11 = vmov (!%p210_p7), 0   ;;  %v368_v12 = vld [vmem:[%s632_s3] sm:$0xff] (!%p210_p7)  ;;  %vm272_vm0 = vcmask (!%p210_p7), 1043456   ;;  %vm268_vm1 = vcmask (!%p210_p7), 293888  }
  0x1b   : > { %213 = sbr.rel (%p210_p7) target bundleno = 263 (0x107), region = 55  ;;  %343 = vmatprep.mubr.f32.mxu0 (!%p210_p7), %v541_v10  ;;  %514 = vset.pattern.permute.xlu0 (!%p210_p7), %v542_v11  ;;  %v257_v27 = vld [vmem:[%s631_s2] sm:$0xff] (!%p210_p7)  ;;  %s469_s11 = sshll.u32 (!%p210_p7), %s462_s18, 1  ;;  %v356_v30 = vlaneseq (!%p210_p7) }
  0x1c   : > { %s487_s5 = smul.u32 (!%p210_p7), 80, %s216_s30  ;;  %371 = vperm.xlu0 (!%p210_p7), %514, %v368_v12   ;;  %p247_p8 = scmp.lt.s32.totalorder (!%p210_p7), %s469_s11, 3 }
  0x1d   : > { %v357_v31 = vshrl.u32 (!%p210_p7), %v356_v30, 7 }
  0x1e   : > { %s218_s8 = scalar_lea.vmem (!%p210_p7), [#allocation2], %s487_s5 }
  0x1f   : > { %v259_v13 = vld [vmem:[%s218_s8 + $0x8] sm:$0xff] (!%p210_p7)  ;;  %v261_v14 = vld [vmem:[%s218_s8 + $0x18] sm:$0xff] (!%p210_p7)  ;;  %v258_v15 = vld [vmem:[%s218_s8] sm:$0xff] (!%p210_p7)  ;;  %v358_v32 = vsub.s32 (!%p210_p7), 0, %v357_v31  ;;  %v362_v34 = vsub.s32 (!%p210_p7), 1, %v357_v31 }
  0x20   : > { %v478_v16 = vpack.c.bf16 (!%p210_p7), %v261_v14, %v259_v13  ;;  %v260_v17 = vld [vmem:[%s218_s8 + $0x10] sm:$0xff] (!%p210_p7)  ;;  %v263_v18 = vld [vmem:[%s218_s8 + $0x28] sm:$0xff] (!%p210_p7)  ;;  %v265_v19 = vld [vmem:[%s218_s8 + $0x38] sm:$0xff] (!%p210_p7) }
  0x21   : > { %v480_v20 = vpack.c.bf16 (!%p210_p7), %v260_v17, %v258_v15  ;;  %v482_v21 = vpack.c.bf16 (!%p210_p7), %v265_v19, %v263_v18  ;;  %v262_v22 = vld [vmem:[%s218_s8 + $0x20] sm:$0xff] (!%p210_p7)  ;;  %v264_v23 = vld [vmem:[%s218_s8 + $0x30] sm:$0xff] (!%p210_p7)  ;;  %v267_v25 = vld [vmem:[%s218_s8 + $0x48] sm:$0xf] (!%p210_p7) }
  0x22   : > { %479 = vmatprep.subr.bf16.mxu0 %v478_v16  ;;  %v484_v24 = vpack.c.bf16 %v264_v23, %v262_v22  ;;  %v266_v26 = vld [vmem:[%s218_s8 + $0x40] sm:$0xf]  ;;  %s638_s11 = smov (!%p247_p8, %s469_s11), 3 }
  0x23   : > { %481 = vmatpush1.bf16.msra.mxu0 %v480_v20  ;;  %s249_s14 = scalar_lea.vmem %s630_s1, %s638_s11  ;;  %s471_s15 = sshll.u32 %s638_s11, 3 }
  0x24   : > { %483 = vmatprep.subr.bf16.mxu0 %v482_v21  ;;  %v350_v28 = vld [vmem:[%s249_s14] sm:$0x3]  ;;  %s255_s20 = scalar_lea.vmem %s633_s4, %s471_s15 }
  0x25   : > { %vm351_vm2 = vcmp.eq.f32.partialorder %v350_v28, 0.0 }
  0x26   : > { %v352_v29 = vsel %vm351_vm2, 1.0, %v350_v28  ;;  %v376_v35 = vsel %vm351_vm2, 1, %v542_v11 }
  0x27   : > { %485 = vmatpush1.bf16.msra.mxu0 %v484_v24  ;;  %515 = vrcp.f32 %v352_v29  ;;  %v380_v37 = vrot.slane %v376_v35, %v358_v32  ;;  %v384_v39 = vrot.slane %v376_v35, %v362_v34 }
  0x28   : > { %472 = vmatprep.subr.msk.mxu0 %vm272_vm0, %v267_v25 }
  0x29   : > { %vm385_vm3 = vcmp.eq.s32.totalorder %v380_v37, 1  ;;  %vm386_vm4 = vcmp.eq.s32.totalorder %v384_v39, 1 }
  0x2b   : > { %473 = vmatpush1.msk.msra.mxu0 %vm272_vm0, %v266_v26 }
  0x2c   : > { %474 = vmatmul.mubr.msk.f32.vlgmr.msra.gmra.mrb[0].mxu0 %vm268_vm1, %v257_v27 }
  0x31   : > { %v516_v33 = vpop.eup %515 }
  0x32   : > { %v359_v36 = vrot.slane %v516_v33, %v358_v32  ;;  %v363_v38 = vrot.slane %v516_v33, %v362_v34 }
  0x9b   : > { %v372_v41 = vpop.permute.xlu0 %371 }
  0xff   : > { %v345_v40 = vpop.f32.mrb[0].mxu0 }
 0x100   : > { %v366_v42 = vmul.f32 %v359_v36, %v345_v40  ;;  %v347_v43 = vpop.f32.mrb[1].mxu0 }
 0x101   : > { %v367_v44 = vmul.f32 %v363_v38, %v347_v43 }
 0x102   : > { %v374_v45 = vadd.f32 %v372_v41, %v366_v42 }
 0x103   : > { %v375_v46 = vadd.f32 %v372_v41, %v367_v44 }
 0x104   : > { %v387_v47 = vsel %vm385_vm3, 0.0, %v374_v45 }
 0x105   : > { %v388_v48 = vsel %vm386_vm4, 0.0, %v375_v46  ;;  %389 = vst [vmem:[%s255_s20] sm:$0xff] %v387_v47 }
 0x106   : > { %390 = vst [vmem:[%s255_s20 + $0x8] sm:$0xff] %v388_v48 }
 0x107 PF: > { %p11_p9 = scmp.ge.s32.totalorder %s585_s19, 4   ;;  %s634_s15 = smov %s535_s16 }
 0x108   : > { %s635_s16 = smov %s594_s22  ;;  %s636_s17 = smov %s585_s19 }
 0x109   :  { %13 = sbr.rel (!%p11_p9) target bundleno = 2 (0x2), region = 97 }

</bundles_post_ra>
